<compile_context>
chip_gen: v6e
topology: v6e:2x2x1
jax: 0.10.0
libtpu: 0.0.40
codegen_flags: <defaults>
</compile_context>

<pallas_src>
import jax
import jax.numpy as jnp
from jax.experimental import pallas as pl
from jax.experimental.pallas import tpu as pltpu


def _round_up(v, m):
    return (v + m - 1) // m * m


def _pad_to(x, shape):
    """Zero-pad `x` up to `shape` (no-op if already that shape)."""
    pads = [(0, t - s) for s, t in zip(x.shape, shape)]
    if all(p[1] == 0 for p in pads):
        return x
    return jnp.pad(x, pads)


def _select_tiles(n_rows, n_contract, n_cols):
    """Pick (tm, tk, tc, vmem_limit) adapted to the chip's VMEM capacity."""
    try:
        info = pltpu.get_tpu_info()
        vmem_cap = getattr(info, "vmem_capacity_bytes", 64 * 1024 * 1024)
    except Exception:  # conservative fallback if the query is unavailable
        vmem_cap = 64 * 1024 * 1024
    if vmem_cap >= 96 * 1024 * 1024:
        # v5e / v6e: 128 MiB physical VMEM -> larger tiles, raised scoped limit.
        tm_t, tk_t, tc_t = 512, 1024, 512
        vmem_limit = 64 * 1024 * 1024
    else:
        # v7x: 64 MiB physical -> keep the conservative footprint.
        tm_t, tk_t, tc_t = 256, 512, 256
        vmem_limit = 32 * 1024 * 1024
    # Rows (sublane) only need the 16-granule; lane/contraction dims need 128.
    tm = min(tm_t, _round_up(n_rows, 16))
    tk = min(tk_t, _round_up(n_contract, 128))
    tc = min(tc_t, _round_up(n_cols, 128))
    return tm, tk, tc, vmem_limit


def _linear_layer_kernel(a_ref, y_ref, b_ref, o_ref, acc_ref):
    """relu(A @ Y + b) for one (batch, row-tile, col-tile), accumulated over K.

    a_ref  : (1, tm, tk)  A tile (bf16, or original dtype when pass-through)
    y_ref  : (1, tk, tc)  bf16   tile of Y = x0 @ W.T
    b_ref  : (1, tc)      f32    bias tile
    o_ref  : (1, tm, tc)  output tile (caller dtype)
    acc_ref: (tm, tc)     f32 VMEM scratch, resident across K steps
    """
    k = pl.program_id(3)

    @pl.when(k == 0)
    def _init():
        acc_ref[...] = jnp.zeros_like(acc_ref)

    a = a_ref[0]
    if a.dtype != jnp.bfloat16:
        # Tile-wise cast (VPU) when A is fed unpadded in its original dtype.
        a = a.astype(jnp.bfloat16)
    acc_ref[...] += jnp.dot(a, y_ref[0], preferred_element_type=jnp.float32)

    @pl.when(k == pl.num_programs(3) - 1)
    def _finalize():
        x = acc_ref[...] + b_ref[...]
        o_ref[0] = jnp.maximum(x, 0.0).astype(o_ref.dtype)


@jax.jit
def linear_layer_forward(A, x0, weight, bias):
    """A: (B, N, N), x0: (B, N, R), weight: (C, R) PyTorch layout, bias: (C,).

    Returns relu((A @ x0) @ weight.T + bias) with shape (B, N, C).
    """
    B, N, _ = A.shape
    C = weight.shape[0]
    out_dtype = x0.dtype

    # TODO(synk): Dropout is training-only; with DROPOUT=None / eval it is the
    # identity, so it is intentionally omitted from the kernel.

    tm, tk, tc, vmem_limit = _select_tiles(N, N, C)
    Mp = _round_up(N, tm)
    Kp = _round_up(N, tk)
    Cp = _round_up(C, tc)
    n_m, n_c = Mp // tm, Cp // tc

    # v7x load balance: keep the parallel grid extent even so both TCs get work.
    if (B * n_m * n_c) % 2 == 1 and tm >= 32:
        tm //= 2
        Mp = _round_up(N, tm)
        n_m = Mp // tm

    # Algebraic restructure: relu((A@x0)@W.T + b) == relu(A @ (x0@W.T) + b).
    # The small (B,N,R)x(R,C) matmul is precomputed once; the kernel is a single
    # K-tiled matmul with a fused bias+ReLU epilogue.
    # TODO(synk): for COL_DIM >> ROW_DIM a fused two-matmul (C-tiled W) variant
    # would reduce the N^2-term FLOPs; unnecessary for this module's shapes.
    y0 = jnp.einsum(
        "bnr,cr->bnc",
        x0.astype(jnp.bfloat16), weight.astype(jnp.bfloat16),
        preferred_element_type=jnp.float32).astype(jnp.bfloat16)
    y0 = _pad_to(y0, (B, Kp, Cp))

    # A: skip the HBM pad/cast round-trip when already tile-aligned; the kernel
    # casts the tile to bf16 on the fly in that case.
    if Mp == N and Kp == N:
        a_in = A
    else:
        a_in = _pad_to(A.astype(jnp.bfloat16), (B, Mp, Kp))

    b_in = _pad_to(bias.astype(jnp.float32).reshape(1, C), (1, Cp))

    grid = (B, n_m, n_c, Kp // tk)

    flops = 2 * B * Mp * Kp * Cp
    bytes_accessed = (a_in.size * a_in.dtype.itemsize
                      + y0.size * 2
                      + b_in.size * 4
                      + B * Mp * Cp * jnp.dtype(out_dtype).itemsize)

    out_p = pl.pallas_call(
        _linear_layer_kernel,
        out_shape=jax.ShapeDtypeStruct((B, Mp, Cp), out_dtype),
        grid_spec=pltpu.PrefetchScalarGridSpec(
            num_scalar_prefetch=0,
            grid=grid,
            in_specs=[
                pl.BlockSpec((1, tm, tk), lambda b, m, c, k: (b, m, k)),
                pl.BlockSpec((1, tk, tc), lambda b, m, c, k: (b, k, c)),
                pl.BlockSpec((1, tc), lambda b, m, c, k: (0, c)),
            ],
            out_specs=pl.BlockSpec((1, tm, tc), lambda b, m, c, k: (b, m, c)),
            scratch_shapes=[pltpu.VMEM((tm, tc), jnp.float32)],
        ),
        compiler_params=pltpu.CompilerParams(
            dimension_semantics=("parallel", "parallel", "parallel",
                                 "arbitrary"),
            vmem_limit_bytes=vmem_limit,
        ),
        cost_estimate=pl.CostEstimate(
            flops=flops, transcendentals=0, bytes_accessed=bytes_accessed),
    )(a_in, y0, b_in)

    # NOTE: padded rows/cols of out_p hold relu(bias) (zero accumulator + bias);
    # they are sliced off here and never reach the caller.
    return out_p[:, :N, :C]


def reference_forward(A, x0, weight, bias):
    # PyTorch-order reference, matching the kernel's bf16 input quantization,
    # accumulated in f32.
    a = A.astype(jnp.bfloat16).astype(jnp.float32)
    x = x0.astype(jnp.bfloat16).astype(jnp.float32)
    w = weight.astype(jnp.bfloat16).astype(jnp.float32)
    ax = jnp.einsum("bij,bjr->bir", a, x, precision=jax.lax.Precision.HIGHEST)
    y = jnp.einsum("bir,cr->bic", ax, w,
                   precision=jax.lax.Precision.HIGHEST) + bias
    return jnp.maximum(y, 0.0)


if __name__ == "__main__":
    # Small, deterministic shapes: batch=2, N=16 "nodes", ROW_DIM=32, COL_DIM=32.
    B, N, ROW_DIM, COL_DIM = 2, 16, 32, 32

    key = jax.random.PRNGKey(0)
    k_a, k_x, k_w, k_b = jax.random.split(key, 4)

    A = jax.random.normal(k_a, (B, N, N), dtype=jnp.float32)
    x0 = jax.random.normal(k_x, (B, N, ROW_DIM), dtype=jnp.float32)
    # Deterministic synthetic params (shapes match nn.Linear(ROW_DIM, COL_DIM)).
    weight = jax.random.normal(k_w, (COL_DIM, ROW_DIM), dtype=jnp.float32) * 0.1
    bias = jax.random.normal(k_b, (COL_DIM,), dtype=jnp.float32) * 0.1

    out = linear_layer_forward(A, x0, weight, bias)
    out = jax.block_until_ready(out)

    ref = reference_forward(A, x0, weight, bias)
    assert out.shape == (B, N, COL_DIM)
    # bf16 MXU operands with f32 accumulation -> compare at bf16 tolerance.
    assert jnp.allclose(out, ref, atol=3e-2, rtol=3e-2), "mismatch vs reference"

    print("KERNEL_OK")
</pallas_src>

<mosaic_0001>
module attributes {stable_mosaic.version = 11 : i64} {
  func.func @_linear_layer_kernel(%arg0: i32, %arg1: i32, %arg2: i32, %arg3: i32, %arg4: memref<1x16x128xbf16, #tpu.memory_space<vmem>>, %arg5: memref<1x128x128xbf16, #tpu.memory_space<vmem>>, %arg6: memref<1x128xf32, #tpu.memory_space<vmem>>, %arg7: memref<1x16x128xf32, #tpu.memory_space<vmem>>, %arg8: memref<16x128xf32, #tpu.memory_space<vmem>>) attributes {dimension_semantics = [#tpu.dimension_semantics<parallel>, #tpu.dimension_semantics<parallel>, #tpu.dimension_semantics<parallel>, #tpu.dimension_semantics<arbitrary>], iteration_bounds = array<i64: 2, 1, 1, 1>, scalar_prefetch = 0 : i64, scratch_operands = 1 : i64, tpu.core_type = #tpu.core_type<tc>, window_params = [{transform_indices = @transform_0, window_bounds = array<i64: 1, 16, 128>}, {transform_indices = @transform_1, window_bounds = array<i64: 1, 128, 128>}, {transform_indices = @transform_2, window_bounds = array<i64: 1, 128>}, {transform_indices = @transform_3, window_bounds = array<i64: 1, 16, 128>}]} {
    %c0_i32 = arith.constant 0 : i32
    %0 = arith.cmpi eq, %arg3, %c0_i32 : i32
    %1 = arith.extui %0 : i1 to i32
    %c0_i32_0 = arith.constant 0 : i32
    %2 = arith.cmpi ne, %1, %c0_i32_0 : i32
    scf.if %2 {
      %cst_12 = arith.constant 0.000000e+00 : f32
      %14 = vector.broadcast %cst_12 : f32 to vector<16x128xf32>
      %c0_13 = arith.constant 0 : index
      %c0_14 = arith.constant 0 : index
      %15 = vector.load %arg8[%c0_13, %c0_14] : memref<16x128xf32, #tpu.memory_space<vmem>>, vector<16x128xf32>
      tpu.vector_store %arg8[%c0_13, %c0_14], %14 {strides = array<i32>} : memref<16x128xf32, #tpu.memory_space<vmem>>, vector<16x128xf32>,
    } else {
    }
    %c0 = arith.constant 0 : index
    %c0_1 = arith.constant 0 : index
    %c0_2 = arith.constant 0 : index
    %3 = vector.load %arg4[%c0, %c0_1, %c0_2] : memref<1x16x128xbf16, #tpu.memory_space<vmem>>, vector<1x16x128xbf16>
    %4 = vector.shape_cast %3 : vector<1x16x128xbf16> to vector<16x128xbf16>
    %c0_3 = arith.constant 0 : index
    %c0_4 = arith.constant 0 : index
    %5 = vector.load %arg8[%c0_3, %c0_4] : memref<16x128xf32, #tpu.memory_space<vmem>>, vector<16x128xf32>
    %c0_5 = arith.constant 0 : index
    %c0_6 = arith.constant 0 : index
    %c0_7 = arith.constant 0 : index
    %6 = vector.load %arg5[%c0_5, %c0_6, %c0_7] : memref<1x128x128xbf16, #tpu.memory_space<vmem>>, vector<1x128x128xbf16>
    %7 = vector.shape_cast %6 : vector<1x128x128xbf16> to vector<128x128xbf16>
    %cst = arith.constant dense<0.000000e+00> : vector<16x128xf32>
    %8 = tpu.matmul %4, %7, %cst {dimension_numbers = #tpu.dot_dimension_numbers<[1], [0], [0], [1], [0, 0, 1, 1], [], []>} : vector<16x128xbf16>, vector<128x128xbf16>, vector<16x128xf32> -> vector<16x128xf32>
    %9 = arith.addf %5, %8 : vector<16x128xf32>
    %c0_8 = arith.constant 0 : index
    %c0_9 = arith.constant 0 : index
    %10 = vector.load %arg8[%c0_8, %c0_9] : memref<16x128xf32, #tpu.memory_space<vmem>>, vector<16x128xf32>
    tpu.vector_store %arg8[%c0_8, %c0_9], %9 {strides = array<i32>} : memref<16x128xf32, #tpu.memory_space<vmem>>, vector<16x128xf32>,
    %c0_i32_10 = arith.constant 0 : i32
    %11 = arith.cmpi eq, %arg3, %c0_i32_10 : i32
    %12 = arith.extui %11 : i1 to i32
    %c0_i32_11 = arith.constant 0 : i32
    %13 = arith.cmpi ne, %12, %c0_i32_11 : i32
    scf.if %13 {
      %c0_12 = arith.constant 0 : index
      %c0_13 = arith.constant 0 : index
      %14 = vector.load %arg8[%c0_12, %c0_13] : memref<16x128xf32, #tpu.memory_space<vmem>>, vector<16x128xf32>
      %c0_14 = arith.constant 0 : index
      %c0_15 = arith.constant 0 : index
      %15 = vector.load %arg6[%c0_14, %c0_15] : memref<1x128xf32, #tpu.memory_space<vmem>>, vector<1x128xf32>
      %16 = vector.broadcast %15 : vector<1x128xf32> to vector<16x128xf32>
      %17 = arith.addf %14, %16 : vector<16x128xf32>
      %cst_16 = arith.constant 0.000000e+00 : f32
      %18 = vector.broadcast %cst_16 : f32 to vector<16x128xf32>
      %19 = arith.maximumf %17, %18 : vector<16x128xf32>
      %c0_17 = arith.constant 0 : index
      %c0_18 = arith.constant 0 : index
      %c0_19 = arith.constant 0 : index
      %20 = vector.load %arg7[%c0_17, %c0_18, %c0_19] : memref<1x16x128xf32, #tpu.memory_space<vmem>>, vector<1x16x128xf32>
      %21 = vector.shape_cast %20 : vector<1x16x128xf32> to vector<16x128xf32>
      %22 = vector.shape_cast %19 : vector<16x128xf32> to vector<1x16x128xf32>
      tpu.vector_store %arg7[%c0_17, %c0_18, %c0_19], %22 {strides = array<i32>} : memref<1x16x128xf32, #tpu.memory_space<vmem>>, vector<1x16x128xf32>,
    } else {
    }
    return
  }
  func.func @transform_0(%arg0: i32, %arg1: i32, %arg2: i32, %arg3: i32) -> (i32, i32, i32) {
    %c0_i32 = arith.constant 0 : i32
    return %arg0, %arg1, %arg3 : i32, i32, i32
  }
  func.func @transform_1(%arg0: i32, %arg1: i32, %arg2: i32, %arg3: i32) -> (i32, i32, i32) {
    %c0_i32 = arith.constant 0 : i32
    return %arg0, %arg3, %arg2 : i32, i32, i32
  }
  func.func @transform_2(%arg0: i32, %arg1: i32, %arg2: i32, %arg3: i32) -> (i32, i32) {
    %c0_i32 = arith.constant 0 : i32
    %c0_i32_0 = arith.constant 0 : i32
    return %c0_i32, %arg2 : i32, i32
  }
  func.func @transform_3(%arg0: i32, %arg1: i32, %arg2: i32, %arg3: i32) -> (i32, i32, i32) {
    %c0_i32 = arith.constant 0 : i32
    return %arg0, %arg1, %arg2 : i32, i32, i32
  }
}

</mosaic_0001>

<bundles_post_ra>
// kernel: linear_layer_forward.1
= control target key start
LH: loop header
LB: loop body
LE: loop exit
PB: predicated region body
PF: predicated region fallthrough
CT: control target
= control target key end

     0   :  { %8 = vsyncpa [#allocation4], 0  ;;  %s920_s0 = inlined_call_operand.vmem [shape: bf16[2,16,128], index: 0, kind: input, shape index: {}]   ;;  %s921_s1 = inlined_call_operand.vmem [shape: bf16[2,128,128], index: 1, kind: input, shape index: {}]   ;;  %s922_s2 = inlined_call_operand.vmem [shape: f32[1,128], index: 2, kind: input, shape index: {}]   ;;  %s923_s3 = inlined_call_operand.hbm [shape: f32[2,16,128], index: 3, kind: output, shape index: {}]  }
   0x1   :  { %10 = vsyncpa [#allocation4 + $0x1], 0  ;;  %s800_s12 = smov 0   ;;  %s802_s13 = smov 0  }
   0x2   :  { %s804_s14 = smov 0   ;;  %s806_s15 = smov 0  }
   0x3   :  { %s808_s16 = smov 0   ;;  %s810_s17 = smov 0  }
   0x4 LB: > { %s571_s18 = sadd.s32 4294967295, %s773_s17   ;;  %s572_s19 = sadd.s32 4294967294, %s773_s17   ;;  %s773_s17 = sphi %s810_s17, %s16_s17   ;;  %s769_s16 = sphi %s808_s16, %s930_s16   ;;  %s765_s15 = sphi %s806_s15, %s929_s15   ;;  %s761_s14 = sphi %s804_s14, %s928_s14   ;;  %s757_s13 = sphi %s802_s13, %s927_s13   ;;  %s753_s12 = sphi %s800_s12, %s926_s12  }
   0x5   : > { %s42_s20 = sadd.s32 1, %s769_s16  ;;  %s139_s21 = sadd.s32 1, %s761_s14 }
   0x6   : > { %p44_p0 = scmp.ge.s32.totalorder %s42_s20, 2  ;;  %p149_p1 = scmp.ne.s32.totalorder %s761_s14, %s757_s13 }
   0x7   : > { %p150_p2 = scmp.eq.s32.totalorder %s571_s18, 1  ;;  %p155_p3 = scmp.ne.s32.totalorder %s757_s13, %s753_s12 }
   0x8   : > { %s932_s20 = smov (%p44_p0, %s42_s20), 0  ;;  %p156_p5 = scmp.eq.s32.totalorder %s572_s19, 1 }
   0x9   : > { %p840_p4 = por %p150_p2, %p149_p1  ;;  %s132_s23 = ssub.s32 %s769_s16, %s932_s20 }
   0xa   : > { %p576_p6 = scmp.ge.s32.totalorder %s773_s17, 1  ;;  %p137_p7 = scmp.eq.s32.totalorder %s132_s23, 0 }
   0xb   : > { %p847_p8 = por %p156_p5, %p155_p3  ;;  %p212_p9 = scmp.lt.s32.totalorder %s773_s17, 3 }
   0xc   : > { %s853_s25 = scalar_select %p137_p7, %s761_s14, %s139_s21  }
   0xd   : > { %p213_p10 = pnand %p576_p6, %p212_p9 }
   0xe   : > { %p259_p11 = scmp.lt.s32.totalorder (!%p213_p10), %s765_s15, 1  ;;  %s255_s8 = sand.u32 (!%p213_p10), 1, %s757_s13  }
   0xf   : > { %216 = sbr.rel (%p213_p10) target bundleno = 271 (0x10f), region = 32  ;;  %s577_s11 = sshll.u32 (!%p213_p10), %s255_s8, 4 }
  0x10   : > { %s257_s18 = scalar_lea.vmem (!%p213_p10), [#allocation3], %s577_s11  ;;  %s599_s21 = sshll.u32 (!%p213_p10), %s765_s15, 8 }
  0x11   : > { %s449_s19 = sshll.u32 (!%p213_p10), %s257_s18, 4  ;;  %s875_s28 = scalar_lea.sflag (!%p213_p10), [#allocation4], %s255_s8  ;;  %s868_s19 = int_to_ptr.vmem [resolvable:$true] %s449_s19 }
  0x12   : > { %s697_s29 = scalar_lea.vmem (!%p213_p10), %s868_s19, 256 }
  0x13   : > { %p698_p12 = scmp.ne.s32.totalorder (!%p213_p10), %s868_s19, %s697_s29 }
  0x14   : > { %v775_v0 = vmov 0.0   ;;  %vm776_vm0 = vmmov 0   ;;  %s260_s26 = scalar_select %p259_p11, %s765_s15, 1  ;;  %v591_v10 = vld [vmem:[%s922_s2] ss:$0 sm:$0xff] }
  0x15   : > { %609 = vmatprep.subr.bf16.mxu0 %v775_v0  ;;  %625 = vmatprep.mubr.msk.bf16.mxu0 %vm776_vm0, %v775_v0  ;;  %p699_p13 = pnand %p698_p12, %p840_p4  ;;  %s777_s15 = smov [#allocation3]  }
  0x16   : > { %s598_s27 = sshll.u32 %s260_s26, 6  ;;  %s597_s4 = sshll.u32 %s260_s26, 3 }
  0x17   : > { %s282_s30 = scalar_lea.vmem %s921_s1, %s598_s27  ;;  %s269_s7 = scalar_lea.vmem %s920_s0, %s597_s4 }
  0x18   : > { %v688_v1 = vld [vmem:[%s282_s30 + $0x38] sm:$0xff]   ;;  %v689_v2 = vld [vmem:[%s282_s30 + $0x30] sm:$0xff]   ;;  %v690_v3 = vld [vmem:[%s282_s30 + $0x28] sm:$0xff]   ;;  %s873_s27 = scalar_lea.hbm %s923_s3, %s599_s21  ;;  %p700_p0 = pneg %p699_p13 }
  0x19   : > { %610 = vmatpush3.bf16.msra.mxu0 %v688_v1  ;;  %v691_v4 = vld [vmem:[%s282_s30 + $0x20] sm:$0xff]   ;;  %v692_v5 = vld [vmem:[%s282_s30 + $0x18] sm:$0xff]   ;;  %v693_v6 = vld [vmem:[%s282_s30 + $0x10] sm:$0xff]  }
  0x1a   : > { %611 = vmatprep.subr.bf16.mxu0 %v775_v0  ;;  %v694_v7 = vld [vmem:[%s282_s30 + $0x8] sm:$0xff]   ;;  %v695_v8 = vld [vmem:[%s282_s30] sm:$0xff]   ;;  %s701_s30 = sshll.u32 %s777_s15, 4  ;;  %s702_s30 = int_to_ptr.vmem [resolvable:$false] %s701_s30 }
  0x1b   : > { %v696_v9 = vld [vmem:[%s269_s7] sm:$0xff]   ;;  %s703_s4 = scalar_lea.vmem %s702_s30, 512  ;;  %p704_p1 = scmp.lt.s32.totalorder %s868_s19, %s702_s30 }
  0x1c   : > { %p705_p2 = scmp.lt.s32.totalorder %s703_s4, %s697_s29 }
  0x1d   : > { %612 = vmatpush3.bf16.msra.mxu0 %v689_v2 }
  0x1e   : > { %613 = vmatprep.subr.bf16.mxu0 %v775_v0  ;;  %p706_p3 = por %p705_p2, %p704_p1 }
  0x20   : > { %p707_p5 = pnand %p706_p3, %p700_p0 }
  0x21   : > { %614 = vmatpush3.bf16.msra.mxu0 %v690_v3 }
  0x22   : > { %615 = vmatprep.subr.bf16.mxu0 %v775_v0 }
  0x25   : > { %616 = vmatpush3.bf16.msra.mxu0 %v691_v4 }
  0x26   : > { %617 = vmatprep.subr.bf16.mxu0 %v775_v0 }
  0x29   : > { %618 = vmatpush3.bf16.msra.mxu0 %v692_v5 }
  0x2a   : > { %619 = vmatprep.subr.bf16.mxu0 %v775_v0 }
  0x2d   : > { %620 = vmatpush3.bf16.msra.mxu0 %v693_v6 }
  0x2e   : > { %621 = vmatprep.subr.bf16.mxu0 %v775_v0 }
  0x31   : > { %622 = vmatpush3.bf16.msra.mxu0 %v694_v7 }
  0x32   : > { %623 = vmatprep.subr.bf16.mxu0 %v775_v0 }
  0x35   : > { %624 = vmatpush3.bf16.msra.mxu0 %v695_v8 }
  0x38   : > { %626 = vmatmul.mubr.bf16.vlgmr.msra.gmra.mxu0 %v696_v9 }
  0xf8   : > { %v403_v11 = vpop.f32.mrf.mxu0 }
  0xf9   : > { %v426_v12 = vadd.f32 %v591_v10, %v403_v11 }
  0xfa   : > { %v627_v13 = vpop.f32.mrf.mxu0 }
  0xfb   : > { %v428_v14 = vmax.f32 %v426_v12, 0.0 }
  0xfc   : > { %v406_v15 = vpop.f32.mrf.mxu0 }
  0xfd   : > { %430 = vst [vmem:[%s257_s18] sm:$0xff] %v428_v14  ;;  %v427_v16 = vadd.f32 %v591_v10, %v406_v15 }
  0xfe   : > { %v628_v17 = vpop.f32.mrf.mxu0 }
  0xff   : > { %v429_v18 = vmax.f32 %v427_v16, 0.0 }
 0x101   : > { %431 = vst [vmem:[%s257_s18 + $0x8] sm:$0xff] %v429_v18 }
 0x102   : > { %710 = shalt.err (!%p707_p5)
}
 0x103   : > { %s711_s5 = scalar_lea.hbm %s873_s27, 256  ;;  %s715_s8 = scalar_lea.hbm %s923_s3, 512 }
 0x104   : > { %p712_p6 = scmp.ne.s32.totalorder %s873_s27, %s711_s5  ;;  %p716_p10 = scmp.lt.s32.totalorder %s873_s27, %s923_s3 }
 0x105   : > { %p717_p11 = scmp.lt.s32.totalorder %s715_s8, %s711_s5 }
 0x106   : > { %p713_p7 = pnand %p712_p6, %p840_p4 }
 0x107   : > { %p718_p12 = por %p717_p11, %p716_p10 }
 0x108   : > { %p714_p9 = pneg %p713_p7 }
 0x10a   : > { %p719_p13 = pnand %p718_p12, %p714_p9 }
 0x10c   : > { %722 = shalt.err (!%p719_p13)
}
 0x10d   : > { %s778_s11 = smov 128   ;;  %s779_s18 = smov 8  }
 0x10e   : > { %629 = dma.vmem_to_hbm [thread:$0]  (%p840_p4), %s868_s19, 256, %s873_s27, %s875_s28, %s778_s11, %s778_s11, %s779_s18  }
 0x10f PF: > { %p635_p0 = scmp.ge.s32.totalorder %s773_s17, 2  ;;  %s464_s21 = sand.u32 1, %s753_s12  }
 0x110   : > { %s465_s23 = scalar_lea.sflag [#allocation4], %s464_s21 }
 0x111   : > { %p632_p1 = pnand %p635_p0, %p847_p8 }
 0x113   : > { %p633_p2 = pneg %p632_p1 }
 0x115   : > { %748 = dma.done.wait (%p633_p2), %s465_s23, 256  }
 0x116   : > { %750 = vsyncadd (%p633_p2), %s465_s23, 4294967040  ;;  %s16_s17 = sadd.s32 1, %s773_s17   ;;  %s926_s12 = smov %s757_s13 }
 0x117   : > { %p13_p3 = scmp.ge.s32.totalorder %s16_s17, 4   ;;  %s927_s13 = smov %s761_s14 }
 0x118   : > { %s928_s14 = smov %s853_s25  ;;  %s929_s15 = smov %s769_s16 }
 0x119   : > { %s930_s16 = smov %s932_s20  ;;  %15 = sbr.rel (!%p13_p3) target bundleno = 4 (0x4), region = 81 }
 0x11e   :  { %470 = vsyncpa [#allocation4], 1 }
 0x11f   :  { %472 = vsyncpa [#allocation4 + $0x1], 1 }

</bundles_post_ra>
